<compile_context>
chip_gen: v5e
topology: v5e:2x2
jax: 0.10.0
libtpu: 0.0.40
codegen_flags: <defaults>
</compile_context>

<pallas_src>
import functools

import jax
import jax.numpy as jnp
from jax import lax
from jax.experimental import pallas as pl
from jax.experimental.pallas import tpu as pltpu


def _tap_shift(p, d, lane):
    """Return q with q[..., l] = p[..., l + d] if 0 <= l + d < L else 0.

    `d` is a static Python int, `lane` a pre-built lane-index iota of p.shape.
    Implemented as a lane rotation (XLU) plus a lane mask (VPU) so nothing
    leaves vector registers.
    """
    if d == 0:
        return p
    L = p.shape[-1]
    # pltpu.roll follows jnp.roll semantics: rolled[..., l] = p[..., (l - s) % L].
    # With s = (-d) % L this gives rolled[..., l] = p[..., (l + d) % L].
    rolled = pltpu.roll(p, (-d) % L, p.ndim - 1)
    valid = lane < (L - d) if d > 0 else lane >= (-d)
    return jnp.where(valid, rolled, jnp.zeros_like(rolled))


def _conv_block_kernel(x_ref, w1_ref, b1_ref, w2_ref, b2_ref, out_ref, *,
                       K, pad_left, compute_dtype):
    """Fused ConvBlock for one (batch-tile-flattened) block.

    x_ref  : (Bt*C_in,  L)          compute_dtype
    w1_ref : (K, Bt*C_out, Bt*C_in) compute_dtype   (block-diag across batch)
    b1_ref : (Bt*C_out, 1)          float32
    w2_ref : (K, Bt*C_out, Bt*C_out) compute_dtype
    b2_ref : (Bt*C_out, 1)          float32
    out_ref: (Bt*C_out, L)          float32
    """
    L = x_ref.shape[-1]
    rows_out = out_ref.shape[0]
    lane = lax.broadcasted_iota(jnp.int32, (rows_out, L), 1)  # hoisted mask iota

    x = x_ref[...]                              # (Bt*C_in, L)

    # ---- conv1 ('same' cross-correlation) + bias + ReLU, fp32 accumulate ----
    acc1 = jnp.zeros((rows_out, L), jnp.float32)
    for k in range(K):
        p = jnp.dot(w1_ref[k], x, preferred_element_type=jnp.float32)
        acc1 = acc1 + _tap_shift(p, k - pad_left, lane)
    h = jnp.maximum(acc1 + b1_ref[...], 0.0)    # (Bt*C_out, L) fp32
    h = h.astype(compute_dtype)                 # stays in vregs

    # ---- conv2 + bias + ReLU ----
    acc2 = jnp.zeros((rows_out, L), jnp.float32)
    for k in range(K):
        p = jnp.dot(w2_ref[k], h, preferred_element_type=jnp.float32)
        acc2 = acc2 + _tap_shift(p, k - pad_left, lane)
    y = jnp.maximum(acc2 + b2_ref[...], 0.0)    # (Bt*C_out, L) fp32

    out_ref[...] = y.astype(out_ref.dtype)      # lane-dense store


def _block_diag_taps(w_k, bt):
    """(K, C_out, C_in) -> (K, bt*C_out, bt*C_in) block-diagonal over batch tile."""
    K, co, ci = w_k.shape
    eye = jnp.eye(bt, dtype=w_k.dtype)
    blk = jnp.einsum('bB,koi->kboBi', eye, w_k)
    return blk.reshape(K, bt * co, bt * ci)


def conv_block_forward(x_ncl, w1, b1, w2, b2, kernel_size, *,
                       compute_dtype=jnp.bfloat16, batch_tile=None):
    """ConvBlock forward.

    x_ncl : (B, C_in, L)      -- PyTorch NCL layout
    w1    : (C_out, C_in, K)  -- PyTorch Conv1d weight layout
    b1    : (C_out,)
    w2    : (C_out, C_out, K)
    b2    : (C_out,)
    returns (B, C_out, L) float32
    """
    B, c_in, L = x_ncl.shape
    c_out = w1.shape[0]
    K = kernel_size
    pad_left = (K - 1) // 2   # PyTorch 'same' (stride=1, dilation=1)

    # --- batch-tile selection: pack sequences so one per-tap matmul covers
    #     ~128 output rows; keep blocks sublane-aligned or full-dim. ---
    if batch_tile is None:
        batch_tile = max(1, min(B, max(1, 128 // max(1, c_out))))
    batch_tile = max(1, min(batch_tile, B))
    while B % batch_tile:
        batch_tile -= 1

    def _aligned(bt):
        return (bt * c_in) % 8 == 0 and (bt * c_out) % 8 == 0

    if batch_tile != B and not _aligned(batch_tile):
        cands = [d for d in range(batch_tile + 1, B + 1)
                 if B % d == 0 and (_aligned(d) or d == B)]
        batch_tile = cands[0] if cands else B
    grid_b = B // batch_tile

    rows_in = batch_tile * c_in
    rows_out = batch_tile * c_out

    # --- operands: flattened batch on sublanes, block-diag per-tap weights ---
    x_flat = x_ncl.reshape(B * c_in, L).astype(compute_dtype)
    w1_k = jnp.transpose(w1, (2, 0, 1)).astype(compute_dtype)   # (K, C_out, C_in)
    w2_k = jnp.transpose(w2, (2, 0, 1)).astype(compute_dtype)   # (K, C_out, C_out)
    w1_blk = _block_diag_taps(w1_k, batch_tile)                 # (K, rows_out, rows_in)
    w2_blk = _block_diag_taps(w2_k, batch_tile)                 # (K, rows_out, rows_out)
    b1_blk = jnp.tile(b1.astype(jnp.float32).reshape(1, c_out),
                      (batch_tile, 1)).reshape(rows_out, 1)
    b2_blk = jnp.tile(b2.astype(jnp.float32).reshape(1, c_out),
                      (batch_tile, 1)).reshape(rows_out, 1)

    kernel = functools.partial(_conv_block_kernel, K=K, pad_left=pad_left,
                               compute_dtype=compute_dtype)

    out_flat = pl.pallas_call(
        kernel,
        out_shape=jax.ShapeDtypeStruct((B * c_out, L), jnp.float32),
        grid_spec=pltpu.PrefetchScalarGridSpec(
            num_scalar_prefetch=0,
            grid=(grid_b,),
            in_specs=[
                pl.BlockSpec((rows_in, L), lambda b: (b, 0)),
                pl.BlockSpec((K, rows_out, rows_in), lambda b: (0, 0, 0)),
                pl.BlockSpec((rows_out, 1), lambda b: (0, 0)),
                pl.BlockSpec((K, rows_out, rows_out), lambda b: (0, 0, 0)),
                pl.BlockSpec((rows_out, 1), lambda b: (0, 0)),
            ],
            out_specs=pl.BlockSpec((rows_out, L), lambda b: (b, 0)),
        ),
        compiler_params=pltpu.CompilerParams(
            dimension_semantics=("parallel",),
            vmem_limit_bytes=32 * 1024 * 1024,
        ),
    )(x_flat, w1_blk, b1_blk, w2_blk, b2_blk)
    return out_flat.reshape(B, c_out, L)


def _xavier_uniform(key, shape):
    # Conv1d weight (C_out, C_in, K): fan_in = C_in*K, fan_out = C_out*K
    c_out, c_in, k = shape
    fan_in, fan_out = c_in * k, c_out * k
    bound = (6.0 / (fan_in + fan_out)) ** 0.5
    return jax.random.uniform(key, shape, jnp.float32, -bound, bound)


def _reference_conv_block(x_ncl, w1, b1, w2, b2, K):
    pad_left = (K - 1) // 2
    pad_right = (K - 1) - pad_left
    dn = ("NCH", "OIH", "NCH")
    h = lax.conv_general_dilated(x_ncl, w1, (1,), [(pad_left, pad_right)],
                                 dimension_numbers=dn)
    h = jnp.maximum(h + b1[None, :, None], 0.0)
    o = lax.conv_general_dilated(h, w2, (1,), [(pad_left, pad_right)],
                                 dimension_numbers=dn)
    return jnp.maximum(o + b2[None, :, None], 0.0)


if __name__ == "__main__":
    # Module config (small, consistent with the forward pass).
    kernel_size = 3
    channels_in = 4
    channels_out = 8
    batch = 2
    seq_len = 128   # multiple of 128 -> fully lane-dense stores
    # dropout = 0.25  # defined in __init__ but unused in forward()

    key = jax.random.PRNGKey(0)
    kx, kw1, kb1, kw2, kb2 = jax.random.split(key, 5)

    x = jax.random.normal(kx, (batch, channels_in, seq_len), jnp.float32)

    w1 = _xavier_uniform(kw1, (channels_out, channels_in, kernel_size))
    w2 = _xavier_uniform(kw2, (channels_out, channels_out, kernel_size))
    bb1 = 1.0 / (channels_in * kernel_size) ** 0.5
    bb2 = 1.0 / (channels_out * kernel_size) ** 0.5
    b1 = jax.random.uniform(kb1, (channels_out,), jnp.float32, -bb1, bb1)
    b2 = jax.random.uniform(kb2, (channels_out,), jnp.float32, -bb2, bb2)

    ref = _reference_conv_block(x, w1, b1, w2, b2, kernel_size)

    # Default path: bf16 matmul operands, fp32 accumulation.
    out_bf16 = conv_block_forward(x, w1, b1, w2, b2, kernel_size)
    out_bf16 = jax.block_until_ready(out_bf16)
    assert out_bf16.shape == (batch, channels_out, seq_len)
    assert jnp.allclose(out_bf16, ref, atol=5e-2, rtol=5e-2), \
        "bf16-path mismatch vs reference"

    # fp32-operand path: tight correctness check of the same kernel structure.
    out_f32 = conv_block_forward(x, w1, b1, w2, b2, kernel_size,
                                 compute_dtype=jnp.float32)
    out_f32 = jax.block_until_ready(out_f32)
    assert jnp.allclose(out_f32, ref, atol=1e-4, rtol=1e-4), \
        "fp32-path mismatch vs reference"

    print("KERNEL_OK")
</pallas_src>

<mosaic_0001>
module attributes {stable_mosaic.version = 11 : i64} {
  func.func @_conv_block_kernel(%arg0: i32, %arg1: memref<8x128xbf16, #tpu.memory_space<vmem>>, %arg2: memref<3x16x8xbf16, #tpu.memory_space<vmem>>, %arg3: memref<16x1xf32, #tpu.memory_space<vmem>>, %arg4: memref<3x16x16xbf16, #tpu.memory_space<vmem>>, %arg5: memref<16x1xf32, #tpu.memory_space<vmem>>, %arg6: memref<16x128xf32, #tpu.memory_space<vmem>>) attributes {dimension_semantics = [#tpu.dimension_semantics<parallel>], iteration_bounds = array<i64: 1>, scalar_prefetch = 0 : i64, scratch_operands = 0 : i64, tpu.core_type = #tpu.core_type<tc>, window_params = [{transform_indices = @transform_0, window_bounds = array<i64: 8, 128>}, {pipeline_mode = #tpu.pipeline_mode<synchronous>, transform_indices = @transform_1, window_bounds = array<i64: 3, 16, 8>}, {pipeline_mode = #tpu.pipeline_mode<synchronous>, transform_indices = @transform_2, window_bounds = array<i64: 16, 1>}, {pipeline_mode = #tpu.pipeline_mode<synchronous>, transform_indices = @transform_3, window_bounds = array<i64: 3, 16, 16>}, {pipeline_mode = #tpu.pipeline_mode<synchronous>, transform_indices = @transform_4, window_bounds = array<i64: 16, 1>}, {transform_indices = @transform_5, window_bounds = array<i64: 16, 128>}]} {
    %0 = tpu.iota {dimensions = array<i32: 1>} : vector<16x128xi32>
    %c0 = arith.constant 0 : index
    %c0_0 = arith.constant 0 : index
    %1 = vector.load %arg1[%c0, %c0_0] : memref<8x128xbf16, #tpu.memory_space<vmem>>, vector<8x128xbf16>
    %cst = arith.constant 0.000000e+00 : f32
    %2 = vector.broadcast %cst : f32 to vector<16x128xf32>
    %c0_1 = arith.constant 0 : index
    %c0_2 = arith.constant 0 : index
    %c0_3 = arith.constant 0 : index
    %3 = vector.load %arg2[%c0_1, %c0_2, %c0_3] : memref<3x16x8xbf16, #tpu.memory_space<vmem>>, vector<1x16x8xbf16>
    %4 = vector.shape_cast %3 : vector<1x16x8xbf16> to vector<16x8xbf16>
    %cst_4 = arith.constant dense<0.000000e+00> : vector<16x128xf32>
    %5 = tpu.matmul %4, %1, %cst_4 {dimension_numbers = #tpu.dot_dimension_numbers<[1], [0], [0], [1], [0, 0, 1, 1], [], []>} : vector<16x8xbf16>, vector<8x128xbf16>, vector<16x128xf32> -> vector<16x128xf32>
    %c1_i32 = arith.constant 1 : i32
    %6 = tpu.dynamic_rotate %5 by %c1_i32 dim 1 : vector<16x128xf32>, i32 -> vector<16x128xf32>
    %c1_i32_5 = arith.constant 1 : i32
    %7 = vector.broadcast %c1_i32_5 : i32 to vector<16x128xi32>
    %8 = arith.cmpi sge, %0, %7 : vector<16x128xi32>
    %cst_6 = arith.constant 0.000000e+00 : f32
    %9 = vector.broadcast %cst_6 : f32 to vector<16x128xf32>
    %10 = arith.select %8, %6, %9 : vector<16x128xi1>, vector<16x128xf32>
    %11 = arith.addf %2, %10 : vector<16x128xf32>
    %c1 = arith.constant 1 : index
    %c0_7 = arith.constant 0 : index
    %c0_8 = arith.constant 0 : index
    %12 = vector.load %arg2[%c1, %c0_7, %c0_8] : memref<3x16x8xbf16, #tpu.memory_space<vmem>>, vector<1x16x8xbf16>
    %13 = vector.shape_cast %12 : vector<1x16x8xbf16> to vector<16x8xbf16>
    %cst_9 = arith.constant dense<0.000000e+00> : vector<16x128xf32>
    %14 = tpu.matmul %13, %1, %cst_9 {dimension_numbers = #tpu.dot_dimension_numbers<[1], [0], [0], [1], [0, 0, 1, 1], [], []>} : vector<16x8xbf16>, vector<8x128xbf16>, vector<16x128xf32> -> vector<16x128xf32>
    %15 = arith.addf %11, %14 : vector<16x128xf32>
    %c2 = arith.constant 2 : index
    %c0_10 = arith.constant 0 : index
    %c0_11 = arith.constant 0 : index
    %16 = vector.load %arg2[%c2, %c0_10, %c0_11] : memref<3x16x8xbf16, #tpu.memory_space<vmem>>, vector<1x16x8xbf16>
    %17 = vector.shape_cast %16 : vector<1x16x8xbf16> to vector<16x8xbf16>
    %cst_12 = arith.constant dense<0.000000e+00> : vector<16x128xf32>
    %18 = tpu.matmul %17, %1, %cst_12 {dimension_numbers = #tpu.dot_dimension_numbers<[1], [0], [0], [1], [0, 0, 1, 1], [], []>} : vector<16x8xbf16>, vector<8x128xbf16>, vector<16x128xf32> -> vector<16x128xf32>
    %c127_i32 = arith.constant 127 : i32
    %19 = tpu.dynamic_rotate %18 by %c127_i32 dim 1 : vector<16x128xf32>, i32 -> vector<16x128xf32>
    %c127_i32_13 = arith.constant 127 : i32
    %20 = vector.broadcast %c127_i32_13 : i32 to vector<16x128xi32>
    %21 = arith.cmpi slt, %0, %20 : vector<16x128xi32>
    %cst_14 = arith.constant 0.000000e+00 : f32
    %22 = vector.broadcast %cst_14 : f32 to vector<16x128xf32>
    %23 = arith.select %21, %19, %22 : vector<16x128xi1>, vector<16x128xf32>
    %24 = arith.addf %15, %23 : vector<16x128xf32>
    %c0_15 = arith.constant 0 : index
    %c0_16 = arith.constant 0 : index
    %25 = vector.load %arg3[%c0_15, %c0_16] : memref<16x1xf32, #tpu.memory_space<vmem>>, vector<16x1xf32>
    %26 = vector.broadcast %25 : vector<16x1xf32> to vector<16x128xf32>
    %27 = arith.addf %24, %26 : vector<16x128xf32>
    %cst_17 = arith.constant 0.000000e+00 : f32
    %28 = vector.broadcast %cst_17 : f32 to vector<16x128xf32>
    %29 = arith.maximumf %27, %28 : vector<16x128xf32>
    %30 = arith.truncf %29 : vector<16x128xf32> to vector<16x128xbf16>
    %cst_18 = arith.constant 0.000000e+00 : f32
    %31 = vector.broadcast %cst_18 : f32 to vector<16x128xf32>
    %c0_19 = arith.constant 0 : index
    %c0_20 = arith.constant 0 : index
    %c0_21 = arith.constant 0 : index
    %32 = vector.load %arg4[%c0_19, %c0_20, %c0_21] : memref<3x16x16xbf16, #tpu.memory_space<vmem>>, vector<1x16x16xbf16>
    %33 = vector.shape_cast %32 : vector<1x16x16xbf16> to vector<16x16xbf16>
    %cst_22 = arith.constant dense<0.000000e+00> : vector<16x128xf32>
    %34 = tpu.matmul %33, %30, %cst_22 {dimension_numbers = #tpu.dot_dimension_numbers<[1], [0], [0], [1], [0, 0, 1, 1], [], []>} : vector<16x16xbf16>, vector<16x128xbf16>, vector<16x128xf32> -> vector<16x128xf32>
    %c1_i32_23 = arith.constant 1 : i32
    %35 = tpu.dynamic_rotate %34 by %c1_i32_23 dim 1 : vector<16x128xf32>, i32 -> vector<16x128xf32>
    %c1_i32_24 = arith.constant 1 : i32
    %36 = vector.broadcast %c1_i32_24 : i32 to vector<16x128xi32>
    %37 = arith.cmpi sge, %0, %36 : vector<16x128xi32>
    %cst_25 = arith.constant 0.000000e+00 : f32
    %38 = vector.broadcast %cst_25 : f32 to vector<16x128xf32>
    %39 = arith.select %37, %35, %38 : vector<16x128xi1>, vector<16x128xf32>
    %40 = arith.addf %31, %39 : vector<16x128xf32>
    %c1_26 = arith.constant 1 : index
    %c0_27 = arith.constant 0 : index
    %c0_28 = arith.constant 0 : index
    %41 = vector.load %arg4[%c1_26, %c0_27, %c0_28] : memref<3x16x16xbf16, #tpu.memory_space<vmem>>, vector<1x16x16xbf16>
    %42 = vector.shape_cast %41 : vector<1x16x16xbf16> to vector<16x16xbf16>
    %cst_29 = arith.constant dense<0.000000e+00> : vector<16x128xf32>
    %43 = tpu.matmul %42, %30, %cst_29 {dimension_numbers = #tpu.dot_dimension_numbers<[1], [0], [0], [1], [0, 0, 1, 1], [], []>} : vector<16x16xbf16>, vector<16x128xbf16>, vector<16x128xf32> -> vector<16x128xf32>
    %44 = arith.addf %40, %43 : vector<16x128xf32>
    %c2_30 = arith.constant 2 : index
    %c0_31 = arith.constant 0 : index
    %c0_32 = arith.constant 0 : index
    %45 = vector.load %arg4[%c2_30, %c0_31, %c0_32] : memref<3x16x16xbf16, #tpu.memory_space<vmem>>, vector<1x16x16xbf16>
    %46 = vector.shape_cast %45 : vector<1x16x16xbf16> to vector<16x16xbf16>
    %cst_33 = arith.constant dense<0.000000e+00> : vector<16x128xf32>
    %47 = tpu.matmul %46, %30, %cst_33 {dimension_numbers = #tpu.dot_dimension_numbers<[1], [0], [0], [1], [0, 0, 1, 1], [], []>} : vector<16x16xbf16>, vector<16x128xbf16>, vector<16x128xf32> -> vector<16x128xf32>
    %c127_i32_34 = arith.constant 127 : i32
    %48 = tpu.dynamic_rotate %47 by %c127_i32_34 dim 1 : vector<16x128xf32>, i32 -> vector<16x128xf32>
    %c127_i32_35 = arith.constant 127 : i32
    %49 = vector.broadcast %c127_i32_35 : i32 to vector<16x128xi32>
    %50 = arith.cmpi slt, %0, %49 : vector<16x128xi32>
    %cst_36 = arith.constant 0.000000e+00 : f32
    %51 = vector.broadcast %cst_36 : f32 to vector<16x128xf32>
    %52 = arith.select %50, %48, %51 : vector<16x128xi1>, vector<16x128xf32>
    %53 = arith.addf %44, %52 : vector<16x128xf32>
    %c0_37 = arith.constant 0 : index
    %c0_38 = arith.constant 0 : index
    %54 = vector.load %arg5[%c0_37, %c0_38] : memref<16x1xf32, #tpu.memory_space<vmem>>, vector<16x1xf32>
    %55 = vector.broadcast %54 : vector<16x1xf32> to vector<16x128xf32>
    %56 = arith.addf %53, %55 : vector<16x128xf32>
    %cst_39 = arith.constant 0.000000e+00 : f32
    %57 = vector.broadcast %cst_39 : f32 to vector<16x128xf32>
    %58 = arith.maximumf %56, %57 : vector<16x128xf32>
    %c0_40 = arith.constant 0 : index
    %c0_41 = arith.constant 0 : index
    %59 = vector.load %arg6[%c0_40, %c0_41] : memref<16x128xf32, #tpu.memory_space<vmem>>, vector<16x128xf32>
    tpu.vector_store %arg6[%c0_40, %c0_41], %58 {strides = array<i32>} : memref<16x128xf32, #tpu.memory_space<vmem>>, vector<16x128xf32>,
    return
  }
  func.func @transform_0(%arg0: i32) -> (i32, i32) {
    %c0_i32 = arith.constant 0 : i32
    %c0_i32_0 = arith.constant 0 : i32
    return %arg0, %c0_i32 : i32, i32
  }
  func.func @transform_1(%arg0: i32) -> (i32, i32, i32) {
    %c0_i32 = arith.constant 0 : i32
    %c0_i32_0 = arith.constant 0 : i32
    %c0_i32_1 = arith.constant 0 : i32
    %c0_i32_2 = arith.constant 0 : i32
    return %c0_i32, %c0_i32_0, %c0_i32_1 : i32, i32, i32
  }
  func.func @transform_2(%arg0: i32) -> (i32, i32) {
    %c0_i32 = arith.constant 0 : i32
    %c0_i32_0 = arith.constant 0 : i32
    %c0_i32_1 = arith.constant 0 : i32
    return %c0_i32, %c0_i32_0 : i32, i32
  }
  func.func @transform_3(%arg0: i32) -> (i32, i32, i32) {
    %c0_i32 = arith.constant 0 : i32
    %c0_i32_0 = arith.constant 0 : i32
    %c0_i32_1 = arith.constant 0 : i32
    %c0_i32_2 = arith.constant 0 : i32
    return %c0_i32, %c0_i32_0, %c0_i32_1 : i32, i32, i32
  }
  func.func @transform_4(%arg0: i32) -> (i32, i32) {
    %c0_i32 = arith.constant 0 : i32
    %c0_i32_0 = arith.constant 0 : i32
    %c0_i32_1 = arith.constant 0 : i32
    return %c0_i32, %c0_i32_0 : i32, i32
  }
  func.func @transform_5(%arg0: i32) -> (i32, i32) {
    %c0_i32 = arith.constant 0 : i32
    %c0_i32_0 = arith.constant 0 : i32
    return %arg0, %c0_i32 : i32, i32
  }
}

</mosaic_0001>

<bundles_post_ra>
// kernel: tpu_custom_call.1
= control target key start
LH: loop header
LB: loop body
LE: loop exit
PB: predicated region body
PF: predicated region fallthrough
CT: control target
= control target key end

     0   :  { %vm36_vm0 = vcmask 1043456   ;;  %s437_s0 = inlined_call_operand.vmem [shape: bf16[8,128], index: 0, kind: input, shape index: {}]   ;;  %s438_s1 = inlined_call_operand.vmem [shape: bf16[3,16,8], index: 1, kind: input, shape index: {}]   ;;  %s439_s2 = inlined_call_operand.vmem [shape: f32[16,1], index: 2, kind: input, shape index: {}]   ;;  %s440_s3 = inlined_call_operand.vmem [shape: bf16[3,16,16], index: 3, kind: input, shape index: {}]   ;;  %s441_s4 = inlined_call_operand.vmem [shape: f32[16,1], index: 4, kind: input, shape index: {}]   ;;  %s442_s5 = inlined_call_operand.hbm [shape: f32[16,128], index: 5, kind: output, shape index: {}]  }
   0x1   :  { %v24_v0 = vld [vmem:[%s437_s0] sm:$0xf]  ;;  %v310_v3 = vld [vmem:[%s438_s1 + $0x10] sm:$0xff] }
   0x2   :  { %v38_v1 = vsel %vm36_vm0, %v24_v0, 0  ;;  %v308_v2 = vld [vmem:[%s438_s1] sm:$0xff] }
   0x3   :  { %10 = vsyncpa [#allocation3], 0  ;;  %47 = vmatpush.bf16.msra.mxu0 %v38_v1  ;;  %108 = vmatpush.bf16.msra.mxu2 %v38_v1  ;;  %vm32_vm1 = vcmask 64512   ;;  %v309_v4 = vld [vmem:[%s438_s1 + $0x8] sm:$0xff]  ;;  %v124_v5 = vld [vmem:[%s439_s2] sm:$0xff]  ;;  %v349_v6 = vmov 0   ;;  %v22_v12 = vlaneseq }
   0x4   :  { %81 = vmatpush.bf16.msra.mxu1 %v38_v1  ;;  %320 = vset.pattern.permute.xlu2 %v349_v6  ;;  %v125_v7 = vld [vmem:[%s439_s2 + $0x8] sm:$0xff]  ;;  %s350_s1 = smov 1   ;;  %s351_s29 = smov 127   ;;  %v311_v35 = vld [vmem:[%s440_s3] sm:$0xff]  ;;  %vm148_vm4 = vcmask 130048   ;;  %v313_v37 = vld [vmem:[%s440_s3 + $0x10] sm:$0xff] }
   0x5   :  { %321 = vset.pattern.permute.xlu1 %v349_v6  ;;  %128 = vperm.xlu2 %320, %v124_v5   ;;  %v23_v13 = vand.u32 127, %v22_v12  ;;  %v312_v36 = vld [vmem:[%s440_s3 + $0x8] sm:$0xff]  ;;  %v234_v43 = vld [vmem:[%s441_s4] sm:$0xff]  ;;  %s258_s16 = sshll.u32 %s442_s5, 4  ;;  %s353_s17 = smov 128   ;;  %s259_s16 = int_to_ptr.hbm [resolvable:$true] %s258_s16 }
   0x6   :  { %274 = vmatmul.msk.bf16.vlgmr.msra.gmra.mxu0 %vm32_vm1, %v308_v2  ;;  %288 = vmatmul.msk.bf16.vlgmr.msra.gmra.mxu2 %vm32_vm1, %v310_v3  ;;  %v235_v40 = vld [vmem:[%s441_s4 + $0x8] sm:$0xff]  ;;  %s352_s4 = smov [#allocation2]   ;;  %s354_s18 = smov 8  }
   0x7   :  { %281 = vmatmul.msk.bf16.vlgmr.msra.gmra.mxu1 %vm32_vm1, %v309_v4  ;;  %322 = vset.pattern.permute.xlu0 %v349_v6  ;;  %vm58_vm2 = vcmp.ge.s32.totalorder %v23_v13, 1  ;;  %vm119_vm3 = vcmp.lt.s32.totalorder %v23_v13, 127  ;;  %s256_s13 = sshll.u32 %s352_s4, 4  ;;  %s257_s13 = int_to_ptr.vmem [resolvable:$true] %s256_s13 }
   0xd   :  { %133 = vperm.xlu2 %320, %v125_v7  }
  0x5f   :  { %v129_v18 = vpop.permute.xlu2 %128 }
  0x67   :  { %v134_v30 = vpop.permute.xlu2 %133 }
  0x83   :  { %v49_v8 = vpop.f32.mrf.mxu0 }
  0x84   :  { %54 = vrot.lane.b32.xlu0 %v49_v8, %s350_s1  ;;  %v83_v15 = vpop.f32.mrf.mxu1 }
  0x89   :  { %v110_v9 = vpop.f32.mrf.mxu2 }
  0x8a   :  { %115 = vrot.lane.b32.xlu1 %v110_v9, %s351_s29 }
  0x8b   :  { %v51_v10 = vpop.f32.mrf.mxu0 }
  0x8c   :  { %56 = vrot.lane.b32.xlu0 %v51_v10, %s350_s1  ;;  %v85_v24 = vpop.f32.mrf.mxu1 }
  0x91   :  { %v112_v11 = vpop.f32.mrf.mxu2 }
  0x92   :  { %117 = vrot.lane.b32.xlu1 %v112_v11, %s351_s29 }
  0xf6   :  { %v55_v14 = vpop.permute.xlu0 %54 }
  0xf7   :  { %v59_v16 = vsel %vm58_vm2, %v55_v14, 0.0 }
  0xf8   :  { %v88_v19 = vadd.f32 %v83_v15, %v59_v16 }
  0xfc   :  { %v116_v17 = vpop.permute.xlu1 %115 }
  0xfd   :  { %v120_v21 = vsel %vm119_vm3, %v116_v17, 0.0 }
  0xfe   :  { %v57_v20 = vpop.permute.xlu0 %56  ;;  %v122_v23 = vadd.f32 %v120_v21, %v88_v19 }
  0xff   :  { %v60_v22 = vsel %vm58_vm2, %v57_v20, 0.0 }
 0x100   :  { %v89_v25 = vadd.f32 %v85_v24, %v60_v22  ;;  %v136_v28 = vadd.f32 %v129_v18, %v122_v23 }
 0x102   :  { %v138_v32 = vmax.f32 %v136_v28, 0.0 }
 0x104   :  { %v118_v26 = vpop.permute.xlu1 %117 }
 0x105   :  { %v121_v27 = vsel %vm119_vm3, %v118_v26, 0.0 }
 0x106   :  { %v123_v29 = vadd.f32 %v121_v27, %v89_v25 }
 0x108   :  { %v137_v31 = vadd.f32 %v134_v30, %v123_v29 }
 0x10a   :  { %v139_v33 = vmax.f32 %v137_v31, 0.0 }
 0x10c   :  { %v140_v34 = vpack.c.bf16 %v139_v33, %v138_v32 }
 0x10e   :  { %159 = vmatpush.bf16.msra.mxu3 %v140_v34  ;;  %192 = vmatpush.bf16.msrb.mxu0 %v140_v34 }
 0x10f   :  { %219 = vmatpush.bf16.msrb.mxu1 %v140_v34 }
 0x111   :  { %293 = vmatmul.msk.bf16.vlgmr.msra.gmra.mxu3 %vm148_vm4, %v311_v35  ;;  %300 = vmatmul.msk.bf16.vlgmr.msrb.gmra.mxu0 %vm148_vm4, %v312_v36 }
 0x112   :  { %307 = vmatmul.msk.bf16.vlgmr.msrb.gmra.mxu1 %vm148_vm4, %v313_v37 }
 0x18e   :  { %v194_v44 = vpop.f32.mrf.mxu0 }
 0x18f   :  { %v221_v38 = vpop.f32.mrf.mxu1 }
 0x190   :  { %226 = vrot.lane.b32.xlu2 %v221_v38, %s351_s29 }
 0x194   :  { %v161_v39 = vpop.f32.mrf.mxu3 }
 0x195   :  { %166 = vrot.lane.b32.xlu0 %v161_v39, %s350_s1 }
 0x196   :  { %v196_v50 = vpop.f32.mrf.mxu0 }
 0x197   :  { %v223_v41 = vpop.f32.mrf.mxu1 }
 0x198   :  { %243 = vperm.xlu2 %320, %v235_v40  }
 0x19c   :  { %v163_v42 = vpop.f32.mrf.mxu3 }
 0x19d   :  { %228 = vrot.lane.b32.xlu0 %v223_v41, %s351_s29  ;;  %168 = vrot.lane.b32.xlu1 %v163_v42, %s350_s1 }
 0x1a5   :  { %238 = vperm.xlu1 %321, %v234_v43  }
 0x1ea   :  { %v227_v46 = vpop.permute.xlu2 %226 }
 0x1eb   :  { %v230_v57 = vsel %vm119_vm3, %v227_v46, 0.0 }
 0x1f2   :  { %v244_v56 = vpop.permute.xlu2 %243 }
 0x207   :  { %v167_v45 = vpop.permute.xlu0 %166 }
 0x208   :  { %v170_v47 = vsel %vm58_vm2, %v167_v45, 0.0 }
 0x209   :  { %v199_v53 = vadd.f32 %v194_v44, %v170_v47 }
 0x20b   :  { %v232_v59 = vadd.f32 %v230_v57, %v199_v53 }
 0x20f   :  { %v229_v48 = vpop.permute.xlu0 %228  ;;  %v169_v49 = vpop.permute.xlu1 %168 }
 0x210   :  { %v171_v51 = vsel %vm58_vm2, %v169_v49, 0.0  ;;  %v231_v54 = vsel %vm119_vm3, %v229_v48, 0.0 }
 0x211   :  { %v200_v52 = vadd.f32 %v196_v50, %v171_v51 }
 0x213   :  { %v233_v55 = vadd.f32 %v231_v54, %v200_v52 }
 0x215   :  { %v247_v58 = vadd.f32 %v244_v56, %v233_v55 }
 0x217   :  { %v249_v60 = vmax.f32 %v247_v58, 0.0  ;;  %v239_v61 = vpop.permute.xlu1 %238 }
 0x218   :  { %v246_v62 = vadd.f32 %v239_v61, %v232_v59 }
 0x219   :  { %251 = vst [vmem:[#allocation2 + $0x8] sm:$0xff] %v249_v60 }
 0x21a   :  { %v248_v63 = vmax.f32 %v246_v62, 0.0 }
 0x21c   :  { %250 = vst [vmem:[#allocation2] sm:$0xff] %v248_v63 }
 0x21d   :  { %264 = dma.vmem_to_hbm [thread:$0]  %s257_s13, 256, %s259_s16, [#allocation3], %s353_s17, %s353_s17, %s354_s18  }
 0x21e   :  { %347 = dma.done.wait [#allocation3], 256  }
 0x21f   :  { %348 = vsyncadd [#allocation3], 4294967040 }
 0x220   :  { %269 = vsyncpa [#allocation3], 1 }

</bundles_post_ra>
